<compile_context>
chip_gen: v7x
topology: tpu7x:2x2x1
jax: 0.10.0
libtpu: 0.0.40
codegen_flags: <defaults>
</compile_context>

<pallas_src>
import math

import jax
import jax.numpy as jnp
from jax.experimental import pallas as pl
from jax.experimental.pallas import tpu as pltpu

_LANE = 128
_SUBLANE = 8


def _layer_scale_kernel(x_ref, gamma_ref, o_ref):
    # x_ref: (tile_m, tile_w); gamma_ref: (1, tile_w). Row broadcast is
    # implicit — one VPU multiply per vreg, no explicit broadcast per step.
    o_ref[...] = x_ref[...] * gamma_ref[...]


def _budget():
    """(target tile bytes, vmem_limit cap) — generation-aware, safe default."""
    target, cap = 8 << 20, 56 << 20          # safe on v7x (64 MiB physical VMEM)
    try:
        vmem = int(pltpu.get_tpu_info().vmem_capacity_bytes)
        if vmem >= (128 << 20):              # v5e / v6e: plenty of headroom
            target, cap = 16 << 20, 112 << 20
    except Exception:
        pass
    return target, cap


def layer_scale(x, gamma):
    """y = x * gamma; gamma has shape (D,), x has shape (..., D)."""
    orig_shape = x.shape
    dtype = x.dtype
    D = orig_shape[-1]
    itemsize = jnp.dtype(dtype).itemsize
    # Matches the PyTorch module-dtype behavior (gamma applied in x's dtype).
    gamma = gamma.astype(dtype)

    if x.size == 0:
        return x * gamma  # nothing to stream

    # ---- lane-dense 2-D layout using only free (row-major) reshapes ----
    if D % _LANE == 0:
        W = D
        x2 = x.reshape(-1, W)
        g2 = gamma.reshape(1, W)
    else:
        lcm = (D * _LANE) // math.gcd(D, _LANE)
        if x.size % lcm == 0:
            # Free reshape into a lane-dense slab; gamma pattern identical per row.
            W = lcm
            x2 = x.reshape(-1, W)
            g2 = jnp.tile(gamma, W // D).reshape(1, W)
        else:
            # Full-extent last dim is a legal block; masked lane stores are a
            # VMEM-slot cost hidden under HBM DMA — no extra HBM passes.
            W = D
            x2 = x.reshape(-1, W)
            g2 = gamma.reshape(1, W)

    M = x2.shape[0]
    row_bytes = W * itemsize
    # Native sublane packing rows: f32 -> 8, bf16 -> 16, int8/fp8 -> 32.
    packing = max(_SUBLANE, 32 // itemsize)

    target_tile_bytes, vmem_cap = _budget()

    # ---- tiling: rows first; columns only when rows are extremely wide ----
    if W % _LANE == 0 and W > _LANE and packing * row_bytes > target_tile_bytes:
        # Column tiling keeps ~target-sized tiles (full pipelining) for huge D.
        tile_m = packing
        tile_w = max(_LANE, (target_tile_bytes // (tile_m * itemsize)) // _LANE * _LANE)
        tile_w = min(tile_w, W)
    else:
        tile_w = W
        tile_m = max(packing, (target_tile_bytes // max(row_bytes, 1)) // packing * packing)
        if tile_m >= M:
            if M >= 2 * packing:
                # At least 2 grid steps so both v7x TensorCores get work.
                tile_m = ((pl.cdiv(M, 2) + packing - 1) // packing) * packing
            else:
                tile_m = M  # tiny input: full-extent block is always legal

    grid = (pl.cdiv(M, tile_m), pl.cdiv(W, tile_w))

    tile_bytes = tile_m * tile_w * itemsize
    # Working set ~= double-buffered x + out tiles + gamma + compiler scratch;
    # keep the cap below physical VMEM (v7x headroom per review).
    vmem_limit = int(min(vmem_cap, max(8 << 20, 6 * tile_bytes)))

    # TODO(synk): inference callers could pass input_output_aliases={0: 0} to
    # donate x; skipped here because the wrapper reshape breaks a clean alias.
    out = pl.pallas_call(
        _layer_scale_kernel,
        out_shape=jax.ShapeDtypeStruct((M, W), dtype),
        grid_spec=pltpu.PrefetchScalarGridSpec(
            num_scalar_prefetch=0,
            grid=grid,
            in_specs=[
                pl.BlockSpec((tile_m, tile_w), lambda i, j: (i, j)),
                pl.BlockSpec((1, tile_w), lambda i, j: (0, j)),  # gamma resident
            ],
            out_specs=pl.BlockSpec((tile_m, tile_w), lambda i, j: (i, j)),
        ),
        compiler_params=pltpu.CompilerParams(
            dimension_semantics=("parallel", "parallel"),
            vmem_limit_bytes=vmem_limit,
        ),
        cost_estimate=pl.CostEstimate(
            flops=int(x.size),
            transcendentals=0,
            bytes_accessed=int(2 * x.size * itemsize + W * itemsize),
        ),
    )(x2, g2)

    return out.reshape(orig_shape)


if __name__ == "__main__":
    key = jax.random.PRNGKey(0)
    k0, k1, k2 = jax.random.split(key, 3)
    init_values = 1e-5

    # Case 1: small D (32 < 128), x.size % lcm(32,128) == 0 -> free lane-dense slab.
    B, S, D = 2, 8, 32
    x = jax.random.normal(k0, (B, S, D), dtype=jnp.float32)
    gamma = init_values * jnp.ones((D,), dtype=jnp.float32)
    y = layer_scale(x, gamma)
    jax.block_until_ready(y)
    assert y.shape == x.shape
    assert jnp.allclose(y, x * gamma, atol=1e-6, rtol=1e-6)

    # Case 2: D multiple of 128 -> direct row-tiled path (>= 2 grid steps).
    B2, S2, D2 = 2, 24, 256
    x2 = jax.random.normal(k1, (B2, S2, D2), dtype=jnp.float32)
    gamma2 = init_values * jnp.ones((D2,), dtype=jnp.float32)
    y2 = layer_scale(x2, gamma2)
    jax.block_until_ready(y2)
    assert y2.shape == x2.shape
    assert jnp.allclose(y2, x2 * gamma2, atol=1e-6, rtol=1e-6)

    # Case 3: D not a multiple of 128 and size not a multiple of lcm(D,128)
    # -> full-extent-D block with masked lane stores (no wrapper padding).
    B3, S3, D3 = 3, 5, 48
    x3 = jax.random.normal(k2, (B3, S3, D3), dtype=jnp.float32)
    gamma3 = init_values * jnp.ones((D3,), dtype=jnp.float32)
    y3 = layer_scale(x3, gamma3)
    jax.block_until_ready(y3)
    assert y3.shape == x3.shape
    assert jnp.allclose(y3, x3 * gamma3, atol=1e-6, rtol=1e-6)

    print("KERNEL_OK")
</pallas_src>

<mosaic_0001>
module attributes {stable_mosaic.version = 11 : i64} {
  func.func @_layer_scale_kernel(%arg0: i32, %arg1: i32, %arg2: memref<4x128xf32, #tpu.memory_space<vmem>>, %arg3: memref<1x128xf32, #tpu.memory_space<vmem>>, %arg4: memref<4x128xf32, #tpu.memory_space<vmem>>) attributes {dimension_semantics = [#tpu.dimension_semantics<parallel>, #tpu.dimension_semantics<parallel>], iteration_bounds = array<i64: 1, 1>, scalar_prefetch = 0 : i64, scratch_operands = 0 : i64, tpu.core_type = #tpu.core_type<tc>, window_params = [{transform_indices = @transform_0, window_bounds = array<i64: 4, 128>}, {transform_indices = @transform_1, window_bounds = array<i64: 1, 128>}, {transform_indices = @transform_2, window_bounds = array<i64: 4, 128>}]} {
    %c0 = arith.constant 0 : index
    %c0_0 = arith.constant 0 : index
    %0 = vector.load %arg2[%c0, %c0_0] : memref<4x128xf32, #tpu.memory_space<vmem>>, vector<4x128xf32>
    %c0_1 = arith.constant 0 : index
    %c0_2 = arith.constant 0 : index
    %1 = vector.load %arg3[%c0_1, %c0_2] : memref<1x128xf32, #tpu.memory_space<vmem>>, vector<1x128xf32>
    %2 = vector.broadcast %1 : vector<1x128xf32> to vector<4x128xf32>
    %3 = arith.mulf %0, %2 : vector<4x128xf32>
    %c0_3 = arith.constant 0 : index
    %c0_4 = arith.constant 0 : index
    %4 = vector.load %arg4[%c0_3, %c0_4] : memref<4x128xf32, #tpu.memory_space<vmem>>, vector<4x128xf32>
    tpu.vector_store %arg4[%c0_3, %c0_4], %3 {strides = array<i32>} : memref<4x128xf32, #tpu.memory_space<vmem>>, vector<4x128xf32>,
    return
  }
  func.func @transform_0(%arg0: i32, %arg1: i32) -> (i32, i32) {
    %c0_i32 = arith.constant 0 : i32
    return %arg0, %arg1 : i32, i32
  }
  func.func @transform_1(%arg0: i32, %arg1: i32) -> (i32, i32) {
    %c0_i32 = arith.constant 0 : i32
    %c0_i32_0 = arith.constant 0 : i32
    return %c0_i32, %arg1 : i32, i32
  }
  func.func @transform_2(%arg0: i32, %arg1: i32) -> (i32, i32) {
    %c0_i32 = arith.constant 0 : i32
    return %arg0, %arg1 : i32, i32
  }
}

</mosaic_0001>

<bundles_post_ra>
// kernel: tpu_custom_call.1
= control target key start
LH: loop header
LB: loop body
LE: loop exit
PB: predicated region body
PF: predicated region fallthrough
CT: control target
= control target key end

     0   :  { %7 = vsyncpa [#allocation3], 0  ;;  %s144_s0 = inlined_call_operand.hbm [shape: f32[4,128], index: 0, kind: input, shape index: {}]   ;;  %s145_s1 = inlined_call_operand.vmem [shape: f32[1,128], index: 1, kind: input, shape index: {}]   ;;  %s146_s2 = inlined_call_operand.hbm [shape: f32[4,128], index: 2, kind: output, shape index: {}]  }
   0x1   :  { %8 = vsyncpa [#allocation4], 0  ;;  %s100_s9 = smov [#allocation2]   ;;  %s52_s13 = scalar_lea.hbm %s144_s0, 64 }
   0x2   :  { %s15_s10 = sshll.u32 %s100_s9, 4  ;;  %p53_p0 = scmp.ne.s32.totalorder %s144_s0, %s52_s13  ;;  %s16_s10 = int_to_ptr.vmem [resolvable:$true] %s15_s10 }
   0x3   :  { %p56_p1 = scmp.lt.u32.totalorder %s52_s13, %s144_s0 }
   0x5   :  { %p58_p2 = pnand %p56_p1, %p53_p0 }
   0x7   :  { %61 = shalt.err (!%p58_p2)
}
   0x8   :  { %s62_s18 = scalar_lea.vmem %s16_s10, 64  ;;  %p67_p4 = scmp.lt.s32.totalorder %s16_s10, %s16_s10 }
   0x9   :  { %p63_p3 = scmp.ne.s32.totalorder %s16_s10, %s62_s18  ;;  %p68_p5 = scmp.lt.s32.totalorder %s62_s18, %s62_s18 }
   0xb   :  { %p69_p6 = por %p68_p5, %p67_p4 }
   0xd   :  { %p70_p7 = pnand %p69_p6, %p63_p3 }
   0xf   :  { %73 = shalt.err (!%p70_p7)
}
  0x10   :  { %18 = dma.hbm_to_vmem [thread:$0]  %s144_s0, 64, %s16_s10, [#allocation3]  }
  0x11   :  { %96 = dma.done.wait [#allocation3], 64  }
  0x12   :  { %97 = vsyncadd [#allocation3], 4294967232  ;;  %s101_s21 = smov [#allocation5]   ;;  %v24_v0 = vld [vmem:[#allocation2] sm:$0xf] }
  0x13   :  { %s40_s22 = sshll.u32 %s101_s21, 4  ;;  %v49_v1 = vld [vmem:[%s145_s1] ss:$0 sm:$0xff]  ;;  %s41_s22 = int_to_ptr.vmem [resolvable:$true] %s40_s22 }
  0x14   :  { %v32_v2 = vmul.f32 %v49_v1, %v24_v0  ;;  %s74_s25 = scalar_lea.vmem %s41_s22, 64  ;;  %p79_p9 = scmp.lt.s32.totalorder %s41_s22, %s41_s22 }
  0x15   :  { %p75_p8 = scmp.ne.s32.totalorder %s41_s22, %s74_s25  ;;  %p80_p10 = scmp.lt.s32.totalorder %s74_s25, %s74_s25 }
  0x16   :  { %33 = vst [vmem:[#allocation5] sm:$0xf] %v32_v2 }
  0x17   :  { %p81_p11 = por %p80_p10, %p79_p9 }
  0x19   :  { %p82_p12 = pnand %p81_p11, %p75_p8 }
  0x1b   :  { %85 = shalt.err (!%p82_p12)
}
  0x1c   :  { %s86_s27 = scalar_lea.hbm %s146_s2, 64 }
  0x1d   :  { %p87_p13 = scmp.ne.s32.totalorder %s146_s2, %s86_s27  ;;  %p90_p0 = scmp.lt.u32.totalorder %s86_s27, %s146_s2 }
  0x1f   :  { %p92_p1 = pnand %p90_p0, %p87_p13 }
  0x21   :  { %95 = shalt.err (!%p92_p1)
}
  0x22   :  { %43 = dma.vmem_to_hbm [thread:$0]  %s41_s22, 64, %s146_s2, [#allocation4]  }
  0x23   :  { %98 = dma.done.wait [#allocation4], 64  }
  0x24   :  { %99 = vsyncadd [#allocation4], 4294967232 }
  0x25   :  { %47 = vsyncpa [#allocation3], 1 }
  0x26   :  { %48 = vsyncpa [#allocation4], 1 }

</bundles_post_ra>
